<compile_context>
chip_gen: v7x
topology: tpu7x:2x2x1
jax: 0.10.0
libtpu: 0.0.40
codegen_flags: <defaults>
</compile_context>

<pallas_src>
import jax
import jax.numpy as jnp
from jax.experimental import pallas as pl
from jax.experimental.pallas import tpu as pltpu


def _round_up(x, m):
    return ((x + m - 1) // m) * m


def _cdiv(a, b):
    return -(-a // b)


def _leaky_relu(x, slope=0.2):
    return jnp.where(x > 0, x, slope * x)


def disc_mlp_kernel(x_ref, w1_ref, b1_ref, w2_ref, b2_ref, w3t_ref, b3_ref, o_ref):
    # In-kernel bf16 cast of the f32 batch tile (VPU; hidden under DMA/MXU).
    x = x_ref[...].astype(jnp.bfloat16)

    # Layer 1: (TB, D)bf16 @ (D, 512)bf16 -> f32 on the MXU.
    h1 = jnp.dot(x, w1_ref[...], preferred_element_type=jnp.float32)
    h1 = _leaky_relu(h1 + b1_ref[...])            # f32 bias + LeakyReLU on the VPU

    # Layer 2: (TB, 512)bf16 @ (512, 256)bf16 -> f32 on the MXU.
    h2 = jnp.dot(h1.astype(jnp.bfloat16), w2_ref[...],
                 preferred_element_type=jnp.float32)
    h2 = _leaky_relu(h2 + b2_ref[...])

    # Layer 3 (256 -> 1) as an NT matmul: (1, 256) . (TB, 256)^T -> (1, TB).
    # Lane-dense result row -> unmasked lane stores (no (TB, 1) column output).
    out_row = jax.lax.dot_general(
        w3t_ref[...], h2,
        dimension_numbers=(((1,), (1,)), ((), ())),
        preferred_element_type=jnp.float32)       # (1, TB)
    o_ref[...] = (out_row + b3_ref[0, 0])[None].astype(o_ref.dtype)   # (1, 1, TB)


def _est_vmem_bytes(tb, d, h1, h2):
    x_tile = 2 * tb * d * 4                 # double-buffered f32 x tile
    weights = (d * h1 + h1 * h2) * 2        # bf16 weights, single-buffered
    biases = (h1 + h2 + h2 + 1) * 4         # b1, b2, w3 row, b3
    inter = tb * (h1 + h2) * 4              # f32 h1/h2 temporaries
    out_t = 2 * tb * 4                      # double-buffered output row
    return x_tile + weights + biases + inter + out_t


def discriminator_forward(img, params, *, tb=None):
    """img: (N, C, H, W) float32; params: dict of f32 weights/biases."""
    n = img.shape[0]
    x = img.reshape(n, -1).astype(jnp.float32)   # f32; cast to bf16 in-kernel
    d = x.shape[1]
    h1_dim = params["w1"].shape[1]
    h2_dim = params["w2"].shape[1]

    # bf16 MXU weight operands (halves weight HBM/VMEM); math stays f32.
    w1 = params["w1"].astype(jnp.bfloat16)
    w2 = params["w2"].astype(jnp.bfloat16)
    b1 = params["b1"].reshape(1, h1_dim).astype(jnp.float32)
    b2 = params["b2"].reshape(1, h2_dim).astype(jnp.float32)
    w3t = params["w3"].reshape(1, h2_dim).astype(jnp.float32)   # (1, 256) row
    b3 = params["b3"].reshape(1, 1).astype(jnp.float32)         # SMEM scalar

    # Batch tile: >= 2 grid steps when the batch permits (megacore on v7x),
    # capped at 1024 rows (amortizes per-step overhead), 8-sublane aligned.
    if tb is None:
        tb = max(8, min(1024, _round_up(_cdiv(n, 2), 8)))
    num_tiles = _cdiv(n, tb)
    grid = (num_tiles,)

    est_vmem = _est_vmem_bytes(tb, d, h1_dim, h2_dim)
    vmem_limit = None
    if est_vmem > 12 * 1024 * 1024:          # approaching v5e's 16 MiB default
        vmem_limit = min(int(est_vmem * 1.5), 64 * 1024 * 1024)

    flops = 2 * n * (d * h1_dim + h1_dim * h2_dim + h2_dim)
    bytes_accessed = (n * d * 4 + d * h1_dim * 2 + h1_dim * h2_dim * 2
                      + (h1_dim + h2_dim + h2_dim + 1) * 4 + n * 4)

    resident = lambda i: (0, 0)   # weights/biases: DMA once, stay VMEM-resident

    out = pl.pallas_call(
        disc_mlp_kernel,
        out_shape=jax.ShapeDtypeStruct((num_tiles, 1, tb), jnp.float32),
        grid=grid,
        in_specs=[
            pl.BlockSpec((tb, d), lambda i: (i, 0)),                 # x: streamed
            pl.BlockSpec((d, h1_dim), resident,
                         pipeline_mode=pl.Buffered(1)),              # w1
            pl.BlockSpec((1, h1_dim), resident,
                         pipeline_mode=pl.Buffered(1)),              # b1
            pl.BlockSpec((h1_dim, h2_dim), resident,
                         pipeline_mode=pl.Buffered(1)),              # w2
            pl.BlockSpec((1, h2_dim), resident,
                         pipeline_mode=pl.Buffered(1)),              # b2
            pl.BlockSpec((1, h2_dim), resident,
                         pipeline_mode=pl.Buffered(1)),              # w3 row
            pl.BlockSpec(memory_space=pltpu.MemorySpace.SMEM),       # b3 scalar
        ],
        out_specs=pl.BlockSpec((1, 1, tb), lambda i: (i, 0, 0)),     # lane-dense row
        compiler_params=pltpu.CompilerParams(
            dimension_semantics=("parallel",),
            vmem_limit_bytes=vmem_limit),
        cost_estimate=pl.CostEstimate(flops=flops, transcendentals=0,
                                      bytes_accessed=bytes_accessed),
    )(x, w1, b1, w2, b2, w3t, b3)

    # (num_tiles, 1, TB) -> (N, 1); padded tail rows (if any) are sliced off.
    return out.reshape(-1)[:n].reshape(n, 1)


def init_params(key, in_dim, h1=512, h2=256, out_dim=1):
    """Deterministic synthetic init (PyTorch-Linear-like uniform bounds)."""
    ks = jax.random.split(key, 6)

    def uni(k, shape, fan_in):
        bound = 1.0 / jnp.sqrt(fan_in)
        return jax.random.uniform(k, shape, jnp.float32, -bound, bound)

    return {
        "w1": uni(ks[0], (in_dim, h1), in_dim),
        "b1": uni(ks[1], (1, h1), in_dim),
        "w2": uni(ks[2], (h1, h2), h1),
        "b2": uni(ks[3], (1, h2), h1),
        "w3": uni(ks[4], (h2, out_dim), h2),
        "b3": uni(ks[5], (1, out_dim), h2),
    }


def reference_forward_f32(img, params):
    """Pure f32 reference (PyTorch semantics)."""
    x = img.reshape(img.shape[0], -1)
    h = x @ params["w1"] + params["b1"]
    h = jnp.where(h > 0, h, 0.2 * h)
    h = h @ params["w2"] + params["b2"]
    h = jnp.where(h > 0, h, 0.2 * h)
    return h @ params["w3"] + params["b3"]


def reference_forward_bf16(img, params):
    """Reference mirroring the kernel's bf16-operand / f32-accumulate math."""
    bf = lambda a: a.astype(jnp.bfloat16).astype(jnp.float32)
    x = bf(img.reshape(img.shape[0], -1))
    h = x @ bf(params["w1"]) + params["b1"]
    h = jnp.where(h > 0, h, 0.2 * h)
    h = bf(h) @ bf(params["w2"]) + params["b2"]
    h = jnp.where(h > 0, h, 0.2 * h)
    return h @ params["w3"] + params["b3"]


if __name__ == "__main__":
    # img_shape = (1, channels, img_size, img_size); channels=1, img_size=16
    # -> flattened input dim = 1*1*16*16 = 256.
    batch, channels, img_size = 2, 1, 16
    in_dim = 1 * channels * img_size * img_size

    key = jax.random.PRNGKey(0)
    k_img, k_params, k_img2 = jax.random.split(key, 3)

    img = jax.random.normal(k_img, (batch, channels, img_size, img_size), jnp.float32)
    params = init_params(k_params, in_dim)

    validity = jax.block_until_ready(discriminator_forward(img, params))
    assert validity.shape == (batch, 1)

    # Tight check vs a reference using identical bf16 operands / f32 accumulation.
    ref_bf16 = reference_forward_bf16(img, params)
    assert jnp.allclose(validity, ref_bf16, atol=2e-3, rtol=2e-3)

    # Loose check vs the pure-f32 PyTorch-semantics reference (bf16 cast error).
    ref_f32 = reference_forward_f32(img, params)
    assert jnp.allclose(validity, ref_f32, atol=1e-1, rtol=1e-1)

    # Larger, non-divisible batch: exercises the >=2-step parallel grid, the
    # ragged last block (no jnp.pad), and the lane-dense (1, TB) output path.
    img_big = jax.random.normal(k_img2, (300, channels, img_size, img_size),
                                jnp.float32)
    v_big = jax.block_until_ready(discriminator_forward(img_big, params))
    assert v_big.shape == (300, 1)
    assert jnp.allclose(v_big, reference_forward_bf16(img_big, params),
                        atol=2e-3, rtol=2e-3)

    print("KERNEL_OK")
</pallas_src>

<mosaic_0001>
module attributes {stable_mosaic.version = 11 : i64} {
  func.func @disc_mlp_kernel(%arg0: i32, %arg1: memref<8x256xf32, #tpu.memory_space<vmem>>, %arg2: memref<256x512xbf16, #tpu.memory_space<vmem>>, %arg3: memref<1x512xf32, #tpu.memory_space<vmem>>, %arg4: memref<512x256xbf16, #tpu.memory_space<vmem>>, %arg5: memref<1x256xf32, #tpu.memory_space<vmem>>, %arg6: memref<1x256xf32, #tpu.memory_space<vmem>>, %arg7: memref<1x1xf32, #tpu.memory_space<smem>>, %arg8: memref<1x1x8xf32, #tpu.memory_space<vmem>>) attributes {dimension_semantics = [#tpu.dimension_semantics<parallel>], iteration_bounds = array<i64: 1>, scalar_prefetch = 0 : i64, scratch_operands = 0 : i64, tpu.core_type = #tpu.core_type<tc>, window_params = [{transform_indices = @transform_0, window_bounds = array<i64: 8, 256>}, {pipeline_mode = #tpu.pipeline_mode<synchronous>, transform_indices = @transform_1, window_bounds = array<i64: 256, 512>}, {pipeline_mode = #tpu.pipeline_mode<synchronous>, transform_indices = @transform_2, window_bounds = array<i64: 1, 512>}, {pipeline_mode = #tpu.pipeline_mode<synchronous>, transform_indices = @transform_3, window_bounds = array<i64: 512, 256>}, {pipeline_mode = #tpu.pipeline_mode<synchronous>, transform_indices = @transform_4, window_bounds = array<i64: 1, 256>}, {pipeline_mode = #tpu.pipeline_mode<synchronous>, transform_indices = @transform_5, window_bounds = array<i64: 1, 256>}, {transform_indices = @transform_6, window_bounds = array<i64: 1, 1>}, {transform_indices = @transform_7, window_bounds = array<i64: 1, 1, 8>}]} {
    %c0 = arith.constant 0 : index
    %c0_0 = arith.constant 0 : index
    %0 = vector.load %arg1[%c0, %c0_0] : memref<8x256xf32, #tpu.memory_space<vmem>>, vector<8x256xf32>
    %1 = arith.truncf %0 : vector<8x256xf32> to vector<8x256xbf16>
    %c0_1 = arith.constant 0 : index
    %c0_2 = arith.constant 0 : index
    %2 = vector.load %arg2[%c0_1, %c0_2] : memref<256x512xbf16, #tpu.memory_space<vmem>>, vector<256x512xbf16>
    %cst = arith.constant dense<0.000000e+00> : vector<8x512xf32>
    %3 = tpu.matmul %1, %2, %cst {dimension_numbers = #tpu.dot_dimension_numbers<[1], [0], [0], [1], [0, 0, 1, 1], [], []>} : vector<8x256xbf16>, vector<256x512xbf16>, vector<8x512xf32> -> vector<8x512xf32>
    %c0_3 = arith.constant 0 : index
    %c0_4 = arith.constant 0 : index
    %4 = vector.load %arg3[%c0_3, %c0_4] : memref<1x512xf32, #tpu.memory_space<vmem>>, vector<1x512xf32>
    %5 = vector.broadcast %4 : vector<1x512xf32> to vector<8x512xf32>
    %6 = arith.addf %3, %5 : vector<8x512xf32>
    %cst_5 = arith.constant 0.000000e+00 : f32
    %7 = vector.broadcast %cst_5 : f32 to vector<8x512xf32>
    %8 = arith.cmpf ogt, %6, %7 : vector<8x512xf32>
    %cst_6 = arith.constant 2.000000e-01 : f32
    %9 = vector.broadcast %cst_6 : f32 to vector<8x512xf32>
    %10 = arith.mulf %9, %6 : vector<8x512xf32>
    %11 = arith.select %8, %6, %10 : vector<8x512xi1>, vector<8x512xf32>
    %12 = arith.truncf %11 : vector<8x512xf32> to vector<8x512xbf16>
    %c0_7 = arith.constant 0 : index
    %c0_8 = arith.constant 0 : index
    %13 = vector.load %arg4[%c0_7, %c0_8] : memref<512x256xbf16, #tpu.memory_space<vmem>>, vector<512x256xbf16>
    %cst_9 = arith.constant dense<0.000000e+00> : vector<8x256xf32>
    %14 = tpu.matmul %12, %13, %cst_9 {dimension_numbers = #tpu.dot_dimension_numbers<[1], [0], [0], [1], [0, 0, 1, 1], [], []>} : vector<8x512xbf16>, vector<512x256xbf16>, vector<8x256xf32> -> vector<8x256xf32>
    %c0_10 = arith.constant 0 : index
    %c0_11 = arith.constant 0 : index
    %15 = vector.load %arg5[%c0_10, %c0_11] : memref<1x256xf32, #tpu.memory_space<vmem>>, vector<1x256xf32>
    %16 = vector.broadcast %15 : vector<1x256xf32> to vector<8x256xf32>
    %17 = arith.addf %14, %16 : vector<8x256xf32>
    %cst_12 = arith.constant 0.000000e+00 : f32
    %18 = vector.broadcast %cst_12 : f32 to vector<8x256xf32>
    %19 = arith.cmpf ogt, %17, %18 : vector<8x256xf32>
    %cst_13 = arith.constant 2.000000e-01 : f32
    %20 = vector.broadcast %cst_13 : f32 to vector<8x256xf32>
    %21 = arith.mulf %20, %17 : vector<8x256xf32>
    %22 = arith.select %19, %17, %21 : vector<8x256xi1>, vector<8x256xf32>
    %c0_14 = arith.constant 0 : index
    %c0_15 = arith.constant 0 : index
    %23 = vector.load %arg6[%c0_14, %c0_15] : memref<1x256xf32, #tpu.memory_space<vmem>>, vector<1x256xf32>
    %cst_16 = arith.constant dense<0.000000e+00> : vector<1x8xf32>
    %24 = tpu.matmul %23, %22, %cst_16 {dimension_numbers = #tpu.dot_dimension_numbers<[1], [1], [0], [0], [0, 0, 1, 0], [], []>} : vector<1x256xf32>, vector<8x256xf32>, vector<1x8xf32> -> vector<1x8xf32>
    %c0_17 = arith.constant 0 : index
    %c0_18 = arith.constant 0 : index
    %25 = memref.load %arg7[%c0_17, %c0_18] : memref<1x1xf32, #tpu.memory_space<smem>>
    %26 = vector.broadcast %25 : f32 to vector<1x8xf32>
    %27 = arith.addf %24, %26 : vector<1x8xf32>
    %28 = vector.shape_cast %27 : vector<1x8xf32> to vector<1x1x8xf32>
    %c0_19 = arith.constant 0 : index
    %c0_20 = arith.constant 0 : index
    %c0_21 = arith.constant 0 : index
    %29 = vector.load %arg8[%c0_19, %c0_20, %c0_21] : memref<1x1x8xf32, #tpu.memory_space<vmem>>, vector<1x1x8xf32>
    tpu.vector_store %arg8[%c0_19, %c0_20, %c0_21], %28 {strides = array<i32>} : memref<1x1x8xf32, #tpu.memory_space<vmem>>, vector<1x1x8xf32>,
    return
  }
  func.func @transform_0(%arg0: i32) -> (i32, i32) {
    %c0_i32 = arith.constant 0 : i32
    %c0_i32_0 = arith.constant 0 : i32
    return %arg0, %c0_i32 : i32, i32
  }
  func.func @transform_1(%arg0: i32) -> (i32, i32) {
    %c0_i32 = arith.constant 0 : i32
    %c0_i32_0 = arith.constant 0 : i32
    %c0_i32_1 = arith.constant 0 : i32
    return %c0_i32, %c0_i32_0 : i32, i32
  }
  func.func @transform_2(%arg0: i32) -> (i32, i32) {
    %c0_i32 = arith.constant 0 : i32
    %c0_i32_0 = arith.constant 0 : i32
    %c0_i32_1 = arith.constant 0 : i32
    return %c0_i32, %c0_i32_0 : i32, i32
  }
  func.func @transform_3(%arg0: i32) -> (i32, i32) {
    %c0_i32 = arith.constant 0 : i32
    %c0_i32_0 = arith.constant 0 : i32
    %c0_i32_1 = arith.constant 0 : i32
    return %c0_i32, %c0_i32_0 : i32, i32
  }
  func.func @transform_4(%arg0: i32) -> (i32, i32) {
    %c0_i32 = arith.constant 0 : i32
    %c0_i32_0 = arith.constant 0 : i32
    %c0_i32_1 = arith.constant 0 : i32
    return %c0_i32, %c0_i32_0 : i32, i32
  }
  func.func @transform_5(%arg0: i32) -> (i32, i32) {
    %c0_i32 = arith.constant 0 : i32
    %c0_i32_0 = arith.constant 0 : i32
    %c0_i32_1 = arith.constant 0 : i32
    return %c0_i32, %c0_i32_0 : i32, i32
  }
  func.func @transform_6(%arg0: i32) -> (i32, i32) {
    %c0_i32 = arith.constant 0 : i32
    %c0_i32_0 = arith.constant 0 : i32
    %c0_i32_1 = arith.constant 0 : i32
    return %c0_i32, %c0_i32_0 : i32, i32
  }
  func.func @transform_7(%arg0: i32) -> (i32, i32, i32) {
    %c0_i32 = arith.constant 0 : i32
    %c0_i32_0 = arith.constant 0 : i32
    %c0_i32_1 = arith.constant 0 : i32
    return %arg0, %c0_i32, %c0_i32_0 : i32, i32, i32
  }
}

</mosaic_0001>

<bundles_post_ra>
// kernel: tpu_custom_call.1
= control target key start
LH: loop header
LB: loop body
LE: loop exit
PB: predicated region body
PF: predicated region fallthrough
CT: control target
= control target key end

     0   :  { %13 = vsyncpa [#allocation4], 0  ;;  %s1764_s0 = inlined_call_operand.hbm [shape: f32[2,256], index: 0, kind: input, shape index: {}]   ;;  %s1765_s1 = inlined_call_operand.hbm [shape: bf16[256,512], index: 1, kind: input, shape index: {}]   ;;  %s1766_s2 = inlined_call_operand.vmem [shape: f32[1,512], index: 2, kind: input, shape index: {}]   ;;  %s1767_s3 = inlined_call_operand.hbm [shape: bf16[512,256], index: 3, kind: input, shape index: {}]   ;;  %s1768_s4 = inlined_call_operand.vmem [shape: f32[1,256], index: 4, kind: input, shape index: {}]   ;;  %s1769_s5 = inlined_call_operand.vmem [shape: f32[1,256], index: 5, kind: input, shape index: {}]   ;;  %s1770_s6 = inlined_call_operand.<no memory space> [shape: f32[1,1], index: 6, kind: input, shape index: {}]   ;;  %s1771_s7 = inlined_call_operand.hbm [shape: f32[1,1,8], index: 7, kind: output, shape index: {}]  }
   0x1   :  { %14 = vsyncpa [#allocation7], 0 }
   0x2   :  { %15 = vsyncpa [#allocation5], 0 }
   0x3   :  { %20 = vsyncadd [#allocation4], 192  ;;  %s1624_s24 = smov [#allocation6]   ;;  %s1530_s28 = scalar_lea.hbm %s1765_s1, 8192 }
   0x4   :  { %s33_s25 = sshll.u32 %s1624_s24, 4  ;;  %p1531_p0 = scmp.ne.s32.totalorder %s1765_s1, %s1530_s28  ;;  %s34_s25 = int_to_ptr.vmem [resolvable:$true] %s33_s25 }
   0x5   :  { %p1534_p1 = scmp.lt.u32.totalorder %s1530_s28, %s1765_s1 }
   0x7   :  { %p1536_p2 = pnand %p1534_p1, %p1531_p0 }
   0x9   :  { %1539 = shalt.err (!%p1536_p2)
}
   0xa   :  { %s1540_s10 = scalar_lea.vmem %s34_s25, 8192  ;;  %p1545_p4 = scmp.lt.s32.totalorder %s34_s25, %s34_s25 }
   0xb   :  { %p1541_p3 = scmp.ne.s32.totalorder %s34_s25, %s1540_s10  ;;  %p1546_p5 = scmp.lt.s32.totalorder %s1540_s10, %s1540_s10 }
   0xd   :  { %p1547_p6 = por %p1546_p5, %p1545_p4 }
   0xf   :  { %p1548_p7 = pnand %p1547_p6, %p1541_p3 }
  0x11   :  { %1551 = shalt.err (!%p1548_p7)
}
  0x12   :  { %s1625_s11 = smov 256   ;;  %s1626_s12 = smov 16  }
  0x13   :  { %39 = dma.hbm_to_vmem [thread:$0]  %s1765_s1, 8192, %s34_s25, [#allocation7], %s1625_s11, %s1625_s11, %s1626_s12  }
  0x14   :  { %s1627_s15 = smov [#allocation3]   ;;  %s1552_s19 = scalar_lea.hbm %s1764_s0, 64 }
  0x15   :  { %s21_s16 = sshll.u32 %s1627_s15, 4  ;;  %p1553_p8 = scmp.ne.s32.totalorder %s1764_s0, %s1552_s19  ;;  %s22_s16 = int_to_ptr.vmem [resolvable:$true] %s21_s16 }
  0x16   :  { %p1556_p9 = scmp.lt.u32.totalorder %s1552_s19, %s1764_s0 }
  0x18   :  { %p1558_p10 = pnand %p1556_p9, %p1553_p8 }
  0x1a   :  { %1561 = shalt.err (!%p1558_p10)
}
  0x1b   :  { %s1562_s24 = scalar_lea.vmem %s22_s16, 64  ;;  %s1566_s1 = scalar_lea.vmem %s22_s16, 256 }
  0x1c   :  { %p1563_p11 = scmp.ne.s32.totalorder %s22_s16, %s1562_s24  ;;  %p1567_p12 = scmp.lt.s32.totalorder %s22_s16, %s22_s16 }
  0x1d   :  { %p1568_p13 = scmp.lt.s32.totalorder %s1566_s1, %s1562_s24 }
  0x1f   :  { %p1569_p0 = por %p1568_p13, %p1567_p12 }
  0x21   :  { %p1570_p1 = pnand %p1569_p0, %p1563_p11 }
  0x23   :  { %1573 = shalt.err (!%p1570_p1)
}
  0x24   :  { %s1628_s25 = smov 64   ;;  %s1629_s26 = smov 4  }
  0x25   :  { %27 = dma.hbm_to_vmem [thread:$0]  %s1764_s0, 64, %s22_s16, [#allocation4], %s1628_s25, %s1628_s25, %s1629_s26  }
  0x26   :  { %s1630_s29 = smov [#allocation8]   ;;  %s1574_s10 = scalar_lea.hbm %s1767_s3, 8192 }
  0x27   :  { %s47_s30 = sshll.u32 %s1630_s29, 4  ;;  %p1575_p2 = scmp.ne.s32.totalorder %s1767_s3, %s1574_s10  ;;  %s48_s30 = int_to_ptr.vmem [resolvable:$true] %s47_s30 }
  0x28   :  { %p1578_p3 = scmp.lt.u32.totalorder %s1574_s10, %s1767_s3 }
  0x2a   :  { %p1580_p4 = pnand %p1578_p3, %p1575_p2 }
  0x2c   :  { %1583 = shalt.err (!%p1580_p4)
}
  0x2d   :  { %s1584_s15 = scalar_lea.vmem %s48_s30, 8192  ;;  %p1589_p6 = scmp.lt.s32.totalorder %s48_s30, %s48_s30 }
  0x2e   :  { %p1585_p5 = scmp.ne.s32.totalorder %s48_s30, %s1584_s15  ;;  %p1590_p7 = scmp.lt.s32.totalorder %s1584_s15, %s1584_s15 }
  0x30   :  { %p1591_p8 = por %p1590_p7, %p1589_p6 }
  0x32   :  { %p1592_p9 = pnand %p1591_p8, %p1585_p5 }
  0x34   :  { %1595 = shalt.err (!%p1592_p9)
}
  0x35   :  { %s1631_s0 = smov 128   ;;  %s1632_s16 = smov 8  }
  0x36   :  { %53 = dma.hbm_to_vmem [thread:$0]  %s1767_s3, 8192, %s48_s30, [#allocation7], %s1631_s0, %s1631_s0, %s1632_s16  }
  0x37   :  { %1618 = dma.done.wait [#allocation4], 256  }
  0x38   :  { %1619 = vsyncadd [#allocation4], 4294967040 }
  0x39   :  { %1620 = dma.done.wait [#allocation7], 16384  }
  0x3a   :  { %1621 = vsyncadd [#allocation7], 4294950912  ;;  %v1334_v0 = vld [vmem:[#allocation6 + $0x4] ss:$16 sps:$4 sm:$0xff]   ;;  %v1336_v1 = vld [vmem:[#allocation6] ss:$16 sps:$4 sm:$0xff]   ;;  %v82_v9 = vlaneseq }
  0x3b   :  { %505 = vmatprep.subr.bf16.mxu1 %v1334_v0  ;;  %v1337_v2 = vld [vmem:[#allocation6 + $0x24] ss:$16 sps:$4 sm:$0xff]   ;;  %v1339_v3 = vld [vmem:[#allocation6 + $0x20] ss:$16 sps:$4 sm:$0xff]   ;;  %v1386_v48 = vld [vmem:[#allocation6 + $0xc] ss:$16 sps:$4 sm:$0xff]  }
  0x3c   :  { %506 = vmatpush1.bf16.msra.mxu1 %v1336_v1  ;;  %v1340_v4 = vld [vmem:[#allocation6 + $0x44] ss:$16 sps:$4 sm:$0xff]   ;;  %v1342_v5 = vld [vmem:[#allocation6 + $0x40] ss:$16 sps:$4 sm:$0xff]   ;;  %v1710_v12 = vshrl.u32 %v82_v9, 7  ;;  %s1633_s23 = smov [#allocation9]  }
  0x3d   :  { %507 = vmatprep.subr.bf16.mxu1 %v1337_v2  ;;  %v1343_v6 = vld [vmem:[#allocation6 + $0x64] ss:$16 sps:$4 sm:$0xff]   ;;  %v1345_v7 = vld [vmem:[#allocation6 + $0x60] ss:$16 sps:$4 sm:$0xff]   ;;  %v1384_v50 = vld [vmem:[#allocation6 + $0x8] ss:$16 sps:$4 sm:$0xff]  }
  0x3e   :  { %v1346_v8 = vld [vmem:[#allocation6 + $0x84] ss:$16 sps:$4 sm:$0xff]   ;;  %v1348_v10 = vld [vmem:[#allocation6 + $0x80] ss:$16 sps:$4 sm:$0xff]   ;;  %v1389_v53 = vld [vmem:[#allocation6 + $0x2c] ss:$16 sps:$4 sm:$0xff]  }
  0x3f   :  { %v1349_v11 = vld [vmem:[#allocation6 + $0xa4] ss:$16 sps:$4 sm:$0xff]   ;;  %v1351_v13 = vld [vmem:[#allocation6 + $0xa0] ss:$16 sps:$4 sm:$0xff]   ;;  %v1387_v56 = vld [vmem:[#allocation6 + $0x28] ss:$16 sps:$4 sm:$0xff]  }
  0x40   :  { %508 = vmatpush1.bf16.msra.mxu1 %v1339_v3  ;;  %v1352_v14 = vld [vmem:[#allocation6 + $0xc4] ss:$16 sps:$4 sm:$0xff]   ;;  %v1354_v15 = vld [vmem:[#allocation6 + $0xc0] ss:$16 sps:$4 sm:$0xff]   ;;  %v1392_v57 = vld [vmem:[#allocation6 + $0x4c] ss:$16 sps:$4 sm:$0xff]  }
  0x41   :  { %509 = vmatprep.subr.bf16.mxu1 %v1340_v4  ;;  %v1528_v16 = vld.sshfl [vmem:[#allocation3] sm:$0xff pattern:$0x76325410]  ;;  %v1529_v17 = vld.sshfl [vmem:[#allocation3 + $0x8] sm:$0xff pattern:$0x76325410] }
  0x42   :  { %v1355_v18 = vld [vmem:[#allocation6 + $0xe4] ss:$16 sps:$4 sm:$0xff]   ;;  %v1357_v19 = vld [vmem:[#allocation6 + $0xe0] ss:$16 sps:$4 sm:$0xff]   ;;  %v94_v20 = vcombine.high %v1528_v16, %v1529_v17  ;;  %v93_v46 = vcombine.low %v1528_v16, %v1529_v17  ;;  %v1390_v60 = vld [vmem:[#allocation6 + $0x48] ss:$16 sps:$4 sm:$0xff]  }
  0x43   :  { %v1358_v21 = vld [vmem:[#allocation6 + $0x104] ss:$16 sps:$4 sm:$0xff]   ;;  %v1360_v23 = vld [vmem:[#allocation6 + $0x100] ss:$16 sps:$4 sm:$0xff]   ;;  %v1395_v61 = vld [vmem:[#allocation6 + $0x6c] ss:$16 sps:$4 sm:$0xff]  }
  0x44   :  { %510 = vmatpush1.bf16.msra.mxu1 %v1342_v5  ;;  %v1712_v22 = vpack.c.bf16 %v94_v20, %v94_v20  ;;  %v1361_v24 = vld [vmem:[#allocation6 + $0x124] ss:$16 sps:$4 sm:$0xff]   ;;  %v1363_v25 = vld [vmem:[#allocation6 + $0x120] ss:$16 sps:$4 sm:$0xff]   ;;  %v1715_v52 = vpack.c.bf16 %v93_v46, %v93_v46  ;;  %v1393_v0 = vld [vmem:[#allocation6 + $0x68] ss:$16 sps:$4 sm:$0xff]  }
  0x45   :  { %511 = vmatprep.subr.bf16.mxu1 %v1343_v6  ;;  %v1364_v26 = vld [vmem:[#allocation6 + $0x144] ss:$16 sps:$4 sm:$0xff]   ;;  %v1366_v27 = vld [vmem:[#allocation6 + $0x140] ss:$16 sps:$4 sm:$0xff]   ;;  %v1398_v1 = vld [vmem:[#allocation6 + $0x8c] ss:$16 sps:$4 sm:$0xff]  }
  0x46   :  { %537 = vmatprep.mubr.bf16.mxu1 %v1712_v22  ;;  %v1367_v28 = vld [vmem:[#allocation6 + $0x164] ss:$16 sps:$4 sm:$0xff]   ;;  %v1369_v29 = vld [vmem:[#allocation6 + $0x160] ss:$16 sps:$4 sm:$0xff]   ;;  %v1396_v4 = vld [vmem:[#allocation6 + $0x88] ss:$16 sps:$4 sm:$0xff]  }
  0x47   :  { %v1370_v30 = vld [vmem:[#allocation6 + $0x184] ss:$16 sps:$4 sm:$0xff]   ;;  %v1434_v32 = vld [vmem:[#allocation8] ss:$8 sps:$4 sm:$0xff]   ;;  %v1437_v36 = vld [vmem:[#allocation8 + $0x10] ss:$8 sps:$4 sm:$0xff]  }
  0x48   :  { %512 = vmatpush1.bf16.msra.mxu1 %v1345_v7  ;;  %v1432_v31 = vld [vmem:[#allocation8 + $0x4] ss:$8 sps:$4 sm:$0xff]   ;;  %v1435_v33 = vld [vmem:[#allocation8 + $0x14] ss:$8 sps:$4 sm:$0xff]   ;;  %v1372_v34 = vld [vmem:[#allocation6 + $0x180] ss:$16 sps:$4 sm:$0xff]  }
  0x49   :  { %513 = vmatprep.subr.bf16.mxu1 %v1346_v8  ;;  %999 = vmatprep.subr.bf16.mxu0 %v1432_v31  ;;  %v1373_v35 = vld [vmem:[#allocation6 + $0x1a4] ss:$16 sps:$4 sm:$0xff]   ;;  %v1375_v38 = vld [vmem:[#allocation6 + $0x1a0] ss:$16 sps:$4 sm:$0xff]   ;;  %v1401_v5 = vld [vmem:[#allocation6 + $0xac] ss:$16 sps:$4 sm:$0xff]  }
  0x4a   :  { %1000 = vmatpush1.bf16.msra.mxu0 %v1434_v32  ;;  %v1438_v37 = vld [vmem:[#allocation8 + $0x24] ss:$8 sps:$4 sm:$0xff]   ;;  %v1440_v40 = vld [vmem:[#allocation8 + $0x20] ss:$8 sps:$4 sm:$0xff]   ;;  %v1441_v41 = vld [vmem:[#allocation8 + $0x34] ss:$8 sps:$4 sm:$0xff]  }
  0x4b   :  { %1001 = vmatprep.subr.bf16.mxu0 %v1435_v33  ;;  %v1376_v39 = vld [vmem:[#allocation6 + $0x1c4] ss:$16 sps:$4 sm:$0xff]   ;;  %v1378_v42 = vld [vmem:[#allocation6 + $0x1c0] ss:$16 sps:$4 sm:$0xff]   ;;  %v1399_v8 = vld [vmem:[#allocation6 + $0xa8] ss:$16 sps:$4 sm:$0xff]  }
  0x4c   :  { %514 = vmatpush1.bf16.msra.mxu1 %v1348_v10  ;;  %v1379_v43 = vld [vmem:[#allocation6 + $0x1e4] ss:$16 sps:$4 sm:$0xff]   ;;  %v1443_v44 = vld [vmem:[#allocation8 + $0x30] ss:$8 sps:$4 sm:$0xff]   ;;  %v1446_v49 = vld [vmem:[#allocation8 + $0x40] ss:$8 sps:$4 sm:$0xff]  }
  0x4d   :  { %515 = vmatprep.subr.bf16.mxu1 %v1349_v11  ;;  %v1444_v45 = vld [vmem:[#allocation8 + $0x44] ss:$8 sps:$4 sm:$0xff]   ;;  %v1381_v47 = vld [vmem:[#allocation6 + $0x1e0] ss:$16 sps:$4 sm:$0xff]   ;;  %v1447_v51 = vld [vmem:[#allocation8 + $0x54] ss:$8 sps:$4 sm:$0xff]  }
  0x4e   :  { %1002 = vmatpush1.bf16.msra.mxu0 %v1437_v36  ;;  %v1449_v54 = vld [vmem:[#allocation8 + $0x50] ss:$8 sps:$4 sm:$0xff]   ;;  %v1450_v55 = vld [vmem:[#allocation8 + $0x64] ss:$8 sps:$4 sm:$0xff]   ;;  %v1452_v58 = vld [vmem:[#allocation8 + $0x60] ss:$8 sps:$4 sm:$0xff]  }
  0x4f   :  { %1003 = vmatprep.subr.bf16.mxu0 %v1438_v37  ;;  %v1453_v59 = vld [vmem:[#allocation8 + $0x74] ss:$8 sps:$4 sm:$0xff]   ;;  %v1455_v62 = vld [vmem:[#allocation8 + $0x70] ss:$8 sps:$4 sm:$0xff]   ;;  %v1456_v63 = vld [vmem:[#allocation8 + $0x84] ss:$8 sps:$4 sm:$0xff]  }
  0x50   :  { %516 = vmatpush1.bf16.msra.mxu1 %v1351_v13  ;;  %v1458_v2 = vld [vmem:[#allocation8 + $0x80] ss:$8 sps:$4 sm:$0xff]   ;;  %v1459_v3 = vld [vmem:[#allocation8 + $0x94] ss:$8 sps:$4 sm:$0xff]   ;;  %v1461_v6 = vld [vmem:[#allocation8 + $0x90] ss:$8 sps:$4 sm:$0xff]  }
  0x51   :  { %517 = vmatprep.subr.bf16.mxu1 %v1352_v14  ;;  %v1462_v7 = vld [vmem:[#allocation8 + $0xa4] ss:$8 sps:$4 sm:$0xff]   ;;  %v1464_v10 = vld [vmem:[#allocation8 + $0xa0] ss:$8 sps:$4 sm:$0xff]   ;;  %v1465_v11 = vld [vmem:[#allocation8 + $0xb4] ss:$8 sps:$4 sm:$0xff]  }
  0x52   :  { %1004 = vmatpush1.bf16.msra.mxu0 %v1440_v40  ;;  %v1404_v9 = vld [vmem:[#allocation6 + $0xcc] ss:$16 sps:$4 sm:$0xff]   ;;  %v1402_v13 = vld [vmem:[#allocation6 + $0xc8] ss:$16 sps:$4 sm:$0xff]   ;;  %s1179_s24 = sshll.u32 %s1633_s23, 4  ;;  %vm1171_vm6 = vcmask 57344   ;;  %s1180_s24 = int_to_ptr.vmem [resolvable:$true] %s1179_s24 }
  0x53   :  { %1005 = vmatprep.subr.bf16.mxu0 %v1441_v41  ;;  %v1407_v14 = vld [vmem:[#allocation6 + $0xec] ss:$16 sps:$4 sm:$0xff]   ;;  %v1405_v17 = vld [vmem:[#allocation6 + $0xe8] ss:$16 sps:$4 sm:$0xff]   ;;  %s1596_s1 = scalar_lea.vmem %s1180_s24, 16  ;;  %s1600_s25 = scalar_lea.vmem %s1180_s24, 32 }
  0x54   :  { %518 = vmatpush1.bf16.msra.mxu1 %v1354_v15  ;;  %v1467_v15 = vld [vmem:[#allocation8 + $0xb0] ss:$8 sps:$4 sm:$0xff]   ;;  %v1468_v16 = vld [vmem:[#allocation8 + $0xc4] ss:$8 sps:$4 sm:$0xff]   ;;  %v1471_v20 = vld [vmem:[#allocation8 + $0xd4] ss:$8 sps:$4 sm:$0xff]   ;;  %p1597_p10 = scmp.ne.s32.totalorder %s1180_s24, %s1596_s1  ;;  %p1601_p11 = scmp.lt.s32.totalorder %s1180_s24, %s1180_s24 }
  0x55   :  { %519 = vmatprep.subr.bf16.mxu1 %v1355_v18  ;;  %v1410_v18 = vld [vmem:[#allocation6 + $0x10c] ss:$16 sps:$4 sm:$0xff]   ;;  %v1423_v32 = vld [vmem:[#allocation6 + $0x1a8] ss:$16 sps:$4 sm:$0xff]   ;;  %p1602_p12 = scmp.lt.s32.totalorder %s1600_s25, %s1596_s1 }
  0x56   :  { %1006 = vmatpush1.bf16.msra.mxu0 %v1443_v44  ;;  %v1425_v31 = vld [vmem:[#allocation6 + $0x1ac] ss:$16 sps:$4 sm:$0xff]   ;;  %v1429_v36 = vld [vmem:[#allocation6 + $0x1e8] ss:$16 sps:$4 sm:$0xff]   ;;  %v1729_v44 = vsub.s32 1, %v1710_v12 }
  0x57   :  { %1007 = vmatprep.subr.bf16.mxu0 %v1444_v45  ;;  %v1428_v33 = vld [vmem:[#allocation6 + $0x1cc] ss:$16 sps:$4 sm:$0xff]   ;;  %v1479_v40 = vld [vmem:[#allocation8 + $0xf0] ss:$8 sps:$4 sm:$0xff]   ;;  %p1603_p13 = por %p1602_p12, %p1601_p11 }
  0x58   :  { %520 = vmatpush1.bf16.msra.mxu1 %v1357_v19  ;;  %v1470_v19 = vld [vmem:[#allocation8 + $0xc0] ss:$8 sps:$4 sm:$0xff]   ;;  %v1474_v37 = vld [vmem:[#allocation8 + $0xe4] ss:$8 sps:$4 sm:$0xff]  }
  0x59   :  { %521 = vmatprep.subr.bf16.mxu1 %v1358_v21  ;;  %v1408_v21 = vld [vmem:[#allocation6 + $0x108] ss:$16 sps:$4 sm:$0xff]   ;;  %v1482_v41 = vld [vmem:[#allocation8 + $0x104] ss:$8 sps:$4 sm:$0xff]   ;;  %p1604_p0 = pnand %p1603_p13, %p1597_p10 }
  0x5a   :  { %1008 = vmatpush1.bf16.msra.mxu0 %v1446_v49 }
  0x5b   :  { %1009 = vmatprep.subr.bf16.mxu0 %v1447_v51 }
  0x5c   :  { %522 = vmatpush1.bf16.msra.mxu1 %v1360_v23  ;;  %v1473_v23 = vld [vmem:[#allocation8 + $0xd0] ss:$8 sps:$4 sm:$0xff]  }
  0x5d   :  { %523 = vmatprep.subr.bf16.mxu1 %v1361_v24  ;;  %v1411_v24 = vld [vmem:[#allocation6 + $0x128] ss:$16 sps:$4 sm:$0xff]  }
  0x5e   :  { %1010 = vmatpush1.bf16.msra.mxu0 %v1449_v54 }
  0x5f   :  { %1011 = vmatprep.subr.bf16.mxu0 %v1450_v55 }
  0x60   :  { %524 = vmatpush1.bf16.msra.mxu1 %v1363_v25  ;;  %v1416_v25 = vld [vmem:[#allocation6 + $0x14c] ss:$16 sps:$4 sm:$0xff]  }
  0x61   :  { %525 = vmatprep.subr.bf16.mxu1 %v1364_v26  ;;  %v1414_v26 = vld [vmem:[#allocation6 + $0x148] ss:$16 sps:$4 sm:$0xff]  }
  0x62   :  { %1012 = vmatpush1.bf16.msra.mxu0 %v1452_v58  ;;  %v1480_v58 = vld [vmem:[#allocation8 + $0x100] ss:$8 sps:$4 sm:$0xff]  }
  0x63   :  { %1013 = vmatprep.subr.bf16.mxu0 %v1453_v59 }
  0x64   :  { %526 = vmatpush1.bf16.msra.mxu1 %v1366_v27  ;;  %v1419_v27 = vld [vmem:[#allocation6 + $0x16c] ss:$16 sps:$4 sm:$0xff]  }
  0x65   :  { %527 = vmatprep.subr.bf16.mxu1 %v1367_v28  ;;  %v1417_v28 = vld [vmem:[#allocation6 + $0x168] ss:$16 sps:$4 sm:$0xff]  }
  0x66   :  { %1014 = vmatpush1.bf16.msra.mxu0 %v1455_v62  ;;  %v1488_v62 = vld [vmem:[#allocation8 + $0x124] ss:$8 sps:$4 sm:$0xff]  }
  0x67   :  { %1015 = vmatprep.subr.bf16.mxu0 %v1456_v63  ;;  %v1486_v63 = vld [vmem:[#allocation8 + $0x120] ss:$8 sps:$4 sm:$0xff]  }
  0x68   :  { %528 = vmatpush1.bf16.msra.mxu1 %v1369_v29  ;;  %v1422_v29 = vld [vmem:[#allocation6 + $0x18c] ss:$16 sps:$4 sm:$0xff]  }
  0x69   :  { %529 = vmatprep.subr.bf16.mxu1 %v1370_v30  ;;  %v1420_v30 = vld [vmem:[#allocation6 + $0x188] ss:$16 sps:$4 sm:$0xff]  }
  0x6a   :  { %1016 = vmatpush1.bf16.msra.mxu0 %v1458_v2  ;;  %v1494_v2 = vld [vmem:[#allocation8 + $0x144] ss:$8 sps:$4 sm:$0xff]  }
  0x6b   :  { %1017 = vmatprep.subr.bf16.mxu0 %v1459_v3  ;;  %v1492_v3 = vld [vmem:[#allocation8 + $0x140] ss:$8 sps:$4 sm:$0xff]  }
  0x6c   :  { %530 = vmatpush1.bf16.msra.mxu1 %v1372_v34  ;;  %v1426_v34 = vld [vmem:[#allocation6 + $0x1c8] ss:$16 sps:$4 sm:$0xff]  }
  0x6d   :  { %531 = vmatprep.subr.bf16.mxu1 %v1373_v35  ;;  %v1431_v35 = vld [vmem:[#allocation6 + $0x1ec] ss:$16 sps:$4 sm:$0xff]  }
  0x6e   :  { %1018 = vmatpush1.bf16.msra.mxu0 %v1461_v6  ;;  %v1500_v6 = vld [vmem:[#allocation8 + $0x164] ss:$8 sps:$4 sm:$0xff]  }
  0x6f   :  { %1019 = vmatprep.subr.bf16.mxu0 %v1462_v7  ;;  %v1498_v7 = vld [vmem:[#allocation8 + $0x160] ss:$8 sps:$4 sm:$0xff]  }
  0x70   :  { %532 = vmatpush1.bf16.msra.mxu1 %v1375_v38  ;;  %v1476_v38 = vld [vmem:[#allocation8 + $0xe0] ss:$8 sps:$4 sm:$0xff]  }
  0x71   :  { %533 = vmatprep.subr.bf16.mxu1 %v1376_v39  ;;  %v1477_v39 = vld [vmem:[#allocation8 + $0xf4] ss:$8 sps:$4 sm:$0xff]  }
  0x72   :  { %1020 = vmatpush1.bf16.msra.mxu0 %v1464_v10  ;;  %v1506_v10 = vld [vmem:[#allocation8 + $0x184] ss:$8 sps:$4 sm:$0xff]  }
  0x73   :  { %1021 = vmatprep.subr.bf16.mxu0 %v1465_v11  ;;  %v1504_v11 = vld [vmem:[#allocation8 + $0x180] ss:$8 sps:$4 sm:$0xff]  }
  0x74   :  { %534 = vmatpush1.bf16.msra.mxu1 %v1378_v42  ;;  %v1721_v42 = vsub.s32 0, %v1710_v12 }
  0x75   :  { %535 = vmatprep.subr.bf16.mxu1 %v1379_v43  ;;  %v1726_v43 = vld [vmem:[%s1766_s2] sm:$0xf] }
  0x76   :  { %1022 = vmatpush1.bf16.msra.mxu0 %v1467_v15  ;;  %v168_v45 = vrot.slane %v1726_v43, %v1721_v42  ;;  %v172_v46 = vrot.slane %v1726_v43, %v1729_v44  ;;  %v1512_v15 = vld [vmem:[#allocation8 + $0x1a4] ss:$8 sps:$4 sm:$0xff]  }
  0x77   :  { %1023 = vmatprep.subr.bf16.mxu0 %v1468_v16  ;;  %v1510_v16 = vld [vmem:[#allocation8 + $0x1a0] ss:$8 sps:$4 sm:$0xff]  }
  0x78   :  { %536 = vmatpush1.bf16.msra.mxu1 %v1381_v47 }
  0x79   :  { %546 = vmatprep.subr.bf16.mxu1 %v1386_v48 }
  0x7a   :  { %1024 = vmatpush1.bf16.msra.mxu0 %v1470_v19  ;;  %v1518_v19 = vld [vmem:[#allocation8 + $0x1c4] ss:$8 sps:$4 sm:$0xff]  }
  0x7b   :  { %538 = vmatmul.mubr.bf16.vlgmr.msra.gmra.mrb[0].mxu1 %v1715_v52  ;;  %1025 = vmatprep.subr.bf16.mxu0 %v1471_v20  ;;  %v1516_v20 = vld [vmem:[#allocation8 + $0x1c0] ss:$8 sps:$4 sm:$0xff]  }
  0x7c   :  { %547 = vmatpush1.bf16.msra.mxu1 %v1384_v50  ;;  %578 = vmatprep.mubr.bf16.mxu1 %v1712_v22  ;;  %v1413_v22 = vld [vmem:[#allocation6 + $0x12c] ss:$16 sps:$4 sm:$0xff]  }
  0x7d   :  { %548 = vmatprep.subr.bf16.mxu1 %v1389_v53 }
  0x7e   :  { %1026 = vmatpush1.bf16.msra.mxu0 %v1473_v23  ;;  %v179_v23 = vsub.s32 3, %v1710_v12 }
  0x7f   :  { %1027 = vmatprep.subr.bf16.mxu0 %v1474_v37 }
  0x80   :  { %549 = vmatpush1.bf16.msra.mxu1 %v1387_v56 }
  0x81   :  { %550 = vmatprep.subr.bf16.mxu1 %v1392_v57 }
  0x82   :  { %1028 = vmatpush1.bf16.msra.mxu0 %v1476_v38 }
  0x83   :  { %1029 = vmatprep.subr.bf16.mxu0 %v1477_v39 }
  0x84   :  { %551 = vmatpush1.bf16.msra.mxu1 %v1390_v60  ;;  %v1485_v60 = vld [vmem:[#allocation8 + $0x114] ss:$8 sps:$4 sm:$0xff]  }
  0x85   :  { %552 = vmatprep.subr.bf16.mxu1 %v1395_v61  ;;  %v1483_v61 = vld [vmem:[#allocation8 + $0x110] ss:$8 sps:$4 sm:$0xff]  }
  0x86   :  { %1030 = vmatpush1.bf16.msra.mxu0 %v1479_v40 }
  0x87   :  { %1040 = vmatprep.subr.bf16.mxu0 %v1482_v41 }
  0x88   :  { %553 = vmatpush1.bf16.msra.mxu1 %v1393_v0  ;;  %v1491_v0 = vld [vmem:[#allocation8 + $0x134] ss:$8 sps:$4 sm:$0xff]  }
  0x89   :  { %554 = vmatprep.subr.bf16.mxu1 %v1398_v1  ;;  %v1489_v1 = vld [vmem:[#allocation8 + $0x130] ss:$8 sps:$4 sm:$0xff]  }
  0x8c   :  { %555 = vmatpush1.bf16.msra.mxu1 %v1396_v4  ;;  %v1497_v4 = vld [vmem:[#allocation8 + $0x154] ss:$8 sps:$4 sm:$0xff]  }
  0x8d   :  { %556 = vmatprep.subr.bf16.mxu1 %v1401_v5  ;;  %v1495_v5 = vld [vmem:[#allocation8 + $0x150] ss:$8 sps:$4 sm:$0xff]  }
  0x90   :  { %557 = vmatpush1.bf16.msra.mxu1 %v1399_v8  ;;  %v1503_v8 = vld [vmem:[#allocation8 + $0x174] ss:$8 sps:$4 sm:$0xff]  }
  0x91   :  { %558 = vmatprep.subr.bf16.mxu1 %v1404_v9  ;;  %v1501_v9 = vld [vmem:[#allocation8 + $0x170] ss:$8 sps:$4 sm:$0xff]  }
  0x94   :  { %559 = vmatpush1.bf16.msra.mxu1 %v1402_v13  ;;  %v1509_v13 = vld [vmem:[#allocation8 + $0x194] ss:$8 sps:$4 sm:$0xff]  }
  0x95   :  { %560 = vmatprep.subr.bf16.mxu1 %v1407_v14  ;;  %v1507_v14 = vld [vmem:[#allocation8 + $0x190] ss:$8 sps:$4 sm:$0xff]  }
  0x98   :  { %561 = vmatpush1.bf16.msra.mxu1 %v1405_v17  ;;  %v1515_v17 = vld [vmem:[#allocation8 + $0x1b4] ss:$8 sps:$4 sm:$0xff]  }
  0x99   :  { %562 = vmatprep.subr.bf16.mxu1 %v1410_v18  ;;  %v1513_v18 = vld [vmem:[#allocation8 + $0x1b0] ss:$8 sps:$4 sm:$0xff]  }
  0x9c   :  { %563 = vmatpush1.bf16.msra.mxu1 %v1408_v21  ;;  %v1521_v21 = vld [vmem:[#allocation8 + $0x1d4] ss:$8 sps:$4 sm:$0xff]  }
  0x9d   :  { %564 = vmatprep.subr.bf16.mxu1 %v1413_v22  ;;  %v175_v22 = vsub.s32 2, %v1710_v12 }
  0xa0   :  { %565 = vmatpush1.bf16.msra.mxu1 %v1411_v24  ;;  %v1519_v24 = vld [vmem:[#allocation8 + $0x1d0] ss:$8 sps:$4 sm:$0xff]  }
  0xa1   :  { %566 = vmatprep.subr.bf16.mxu1 %v1416_v25  ;;  %v1524_v25 = vld [vmem:[#allocation8 + $0x1e4] ss:$8 sps:$4 sm:$0xff]  }
  0xa4   :  { %567 = vmatpush1.bf16.msra.mxu1 %v1414_v26  ;;  %v176_v26 = vrot.slane %v1726_v43, %v175_v22 }
  0xa5   :  { %568 = vmatprep.subr.bf16.mxu1 %v1419_v27  ;;  %v180_v27 = vrot.slane %v1726_v43, %v179_v23  ;;  %v1087_v43 = vld [vmem:[%s1769_s5] sm:$0x3] }
  0xa8   :  { %569 = vmatpush1.bf16.msra.mxu1 %v1417_v28  ;;  %v1522_v28 = vld [vmem:[#allocation8 + $0x1e0] ss:$8 sps:$4 sm:$0xff]  }
  0xa9   :  { %570 = vmatprep.subr.bf16.mxu1 %v1422_v29 }
  0xac   :  { %571 = vmatpush1.bf16.msra.mxu1 %v1420_v30  ;;  %v1527_v30 = vld [vmem:[#allocation8 + $0x1f4] ss:$8 sps:$4 sm:$0xff]  }
  0xad   :  { %572 = vmatprep.subr.bf16.mxu1 %v1425_v31 }
  0xb0   :  { %573 = vmatpush1.bf16.msra.mxu1 %v1423_v32 }
  0xb1   :  { %574 = vmatprep.subr.bf16.mxu1 %v1428_v33 }
  0xb4   :  { %575 = vmatpush1.bf16.msra.mxu1 %v1426_v34 }
  0xb5   :  { %576 = vmatprep.subr.bf16.mxu1 %v1431_v35 }
  0xb8   :  { %577 = vmatpush1.bf16.msra.mxu1 %v1429_v36  ;;  %v1525_v36 = vld [vmem:[#allocation8 + $0x1f0] ss:$8 sps:$4 sm:$0xff]  }
  0xbb   :  { %579 = vmatmul.mubr.bf16.vlgmr.msra.gmra.mrb[4].mxu1 %v1715_v52 }
 0x14e   :  { %v539_v47 = vpop.f32.mrb[0].mxu1 }
 0x14f   :  { %v540_v48 = vadd.f32 %v539_v47, %v168_v45  ;;  %v541_v49 = vpop.f32.mrb[1].mxu1  ;;  %v1098_v45 = vrot.slane %v1087_v43, %v1729_v44 }
 0x150   :  { %v542_v50 = vadd.f32 %v541_v49, %v172_v46  ;;  %v543_v51 = vpop.f32.mrb[2].mxu1  ;;  %v667_v46 = vld [vmem:[%s1768_s4] sm:$0x3] }
 0x151   :  { %vm587_vm0 = vcmp.gt.f32.partialorder %v540_v48, 0.0  ;;  %v591_v52 = vmul.f32 0.2, %v540_v48  ;;  %v544_v53 = vpop.f32.mrb[3].mxu1  ;;  %1165 = vmatprep.mubr.f32.mxu1 %v1098_v45  ;;  %v672_v47 = vrot.slane %v667_v46, %v1721_v42 }
 0x152   :  { %vm588_vm1 = vcmp.gt.f32.partialorder %v542_v50, 0.0  ;;  %v592_v54 = vmul.f32 0.2, %v542_v50 }
 0x153   :  { %v595_v55 = vsel %vm587_vm0, %v540_v48, %v591_v52  ;;  %v676_v48 = vrot.slane %v667_v46, %v1729_v44  ;;  %v1089_v44 = vstv %s1770_s6 }
 0x154   :  { %v596_v56 = vsel %vm588_vm1, %v542_v50, %v592_v54  ;;  %v599_v59 = vpack.c.bf16 %v595_v55, %v595_v55 }
 0x155   :  { %v600_v57 = vpack.c.bf16 %v596_v56, %v596_v56 }
 0x157   :  { %1031 = vmatprep.mubr.bf16.mxu0 %v600_v57 }
 0x158   :  { %1032 = vmatmul.mubr.bf16.vlgmr.msra.gmra.mrb[0].mxu0 %v599_v59  ;;  %v1094_v59 = vrot.slane %v1087_v43, %v1721_v42 }
 0x159   :  { %1041 = vmatpush1.bf16.msra.mxu0 %v1480_v58 }
 0x15a   :  { %1042 = vmatprep.subr.bf16.mxu0 %v1485_v60 }
 0x15d   :  { %1043 = vmatpush1.bf16.msra.mxu0 %v1483_v61 }
 0x15e   :  { %1044 = vmatprep.subr.bf16.mxu0 %v1488_v62 }
 0x161   :  { %1045 = vmatpush1.bf16.msra.mxu0 %v1486_v63 }
 0x162   :  { %1046 = vmatprep.subr.bf16.mxu0 %v1491_v0 }
 0x165   :  { %1047 = vmatpush1.bf16.msra.mxu0 %v1489_v1 }
 0x166   :  { %1048 = vmatprep.subr.bf16.mxu0 %v1494_v2 }
 0x169   :  { %1049 = vmatpush1.bf16.msra.mxu0 %v1492_v3 }
 0x16a   :  { %1050 = vmatprep.subr.bf16.mxu0 %v1497_v4 }
 0x16d   :  { %1051 = vmatpush1.bf16.msra.mxu0 %v1495_v5 }
 0x16e   :  { %1052 = vmatprep.subr.bf16.mxu0 %v1500_v6 }
 0x171   :  { %1053 = vmatpush1.bf16.msra.mxu0 %v1498_v7 }
 0x172   :  { %1054 = vmatprep.subr.bf16.mxu0 %v1503_v8 }
 0x175   :  { %1055 = vmatpush1.bf16.msra.mxu0 %v1501_v9 }
 0x176   :  { %1056 = vmatprep.subr.bf16.mxu0 %v1506_v10 }
 0x179   :  { %1057 = vmatpush1.bf16.msra.mxu0 %v1504_v11 }
 0x17a   :  { %1058 = vmatprep.subr.bf16.mxu0 %v1509_v13 }
 0x17d   :  { %1059 = vmatpush1.bf16.msra.mxu0 %v1507_v14 }
 0x17e   :  { %1060 = vmatprep.subr.bf16.mxu0 %v1512_v15 }
 0x181   :  { %1061 = vmatpush1.bf16.msra.mxu0 %v1510_v16 }
 0x182   :  { %1062 = vmatprep.subr.bf16.mxu0 %v1515_v17 }
 0x185   :  { %1063 = vmatpush1.bf16.msra.mxu0 %v1513_v18 }
 0x186   :  { %1064 = vmatprep.subr.bf16.mxu0 %v1518_v19 }
 0x189   :  { %1065 = vmatpush1.bf16.msra.mxu0 %v1516_v20 }
 0x18a   :  { %1066 = vmatprep.subr.bf16.mxu0 %v1521_v21 }
 0x18d   :  { %1067 = vmatpush1.bf16.msra.mxu0 %v1519_v24 }
 0x18e   :  { %v580_v29 = vpop.f32.mrb[4].mxu1  ;;  %1068 = vmatprep.subr.bf16.mxu0 %v1524_v25 }
 0x18f   :  { %v581_v31 = vadd.f32 %v580_v29, %v176_v26  ;;  %v582_v32 = vpop.f32.mrb[5].mxu1 }
 0x190   :  { %v583_v33 = vadd.f32 %v582_v32, %v180_v27  ;;  %v584_v34 = vpop.f32.mrb[6].mxu1 }
 0x191   :  { %vm589_vm2 = vcmp.gt.f32.partialorder %v581_v31, 0.0  ;;  %v593_v35 = vmul.f32 0.2, %v581_v31  ;;  %v585_v12 = vpop.f32.mrb[7].mxu1  ;;  %1069 = vmatpush1.bf16.msra.mxu0 %v1522_v28 }
 0x192   :  { %vm590_vm3 = vcmp.gt.f32.partialorder %v583_v33, 0.0  ;;  %v594_v37 = vmul.f32 0.2, %v583_v33  ;;  %1070 = vmatprep.subr.bf16.mxu0 %v1527_v30 }
 0x193   :  { %v597_v38 = vsel %vm589_vm2, %v581_v31, %v593_v35 }
 0x194   :  { %v598_v39 = vsel %vm590_vm3, %v583_v33, %v594_v37  ;;  %v601_v41 = vpack.c.bf16 %v597_v38, %v597_v38 }
 0x195   :  { %1071 = vmatpush1.bf16.msra.mxu0 %v1525_v36  ;;  %v602_v40 = vpack.c.bf16 %v598_v39, %v598_v39 }
 0x197   :  { %1072 = vmatprep.mubr.bf16.mxu0 %v602_v40 }
 0x198   :  { %1073 = vmatmul.mubr.bf16.vlgmr.msra.gmra.mrb[0].mxu0 %v601_v41 }
 0x26b   :  { %v1074_v49 = vpop.f32.mrb[0].mxu0 }
 0x26c   :  { %v1317_v50 = vadd.f32 %v1074_v49, %v672_v47  ;;  %v1076_v51 = vpop.f32.mrb[1].mxu0 }
 0x26d   :  { %v1318_v52 = vadd.f32 %v1076_v51, %v676_v48  ;;  %v1078_v53 = vpop.f32.mrb[2].mxu0 }
 0x26e   :  { %v1083_v54 = vmul.f32 0.2, %v1317_v50  ;;  %v1079_v55 = vpop.f32.mrb[3].mxu0  ;;  %vm1081_vm4 = vcmp.gt.f32.partialorder %v1317_v50, 0.0 }
 0x26f   :  { %v1084_v56 = vmul.f32 0.2, %v1318_v52  ;;  %vm1082_vm5 = vcmp.gt.f32.partialorder %v1318_v52, 0.0 }
 0x270   :  { %v1085_v58 = vsel %vm1081_vm4, %v1317_v50, %v1083_v54 }
 0x271   :  { %v1086_v57 = vsel %vm1082_vm5, %v1318_v52, %v1084_v56 }
 0x272   :  { %1101 = vmatprep.subr.mxu1 %v1086_v57 }
 0x273   :  { %1102 = vmatpush1.xpose.msra.mxu1 %v1085_v58 }
 0x276   :  { %1166 = vmatmul.mubr.f32.vlgmr.msra.gmra.mrb[8].mxu1 %v1094_v59 }
 0x349   :  { %v1167_v60 = vpop.f32.mrb[8].mxu1 }
 0x34a   :  { %v1168_v61 = vadd.f32 %v1167_v60, %v1089_v44  ;;  %v1169_v62 = vpop.f32.mrb[9].mxu1 }
 0x34c   :  { %1172 = vst.msk [vmem:[#allocation9] sm:$0x1] %vm1171_vm6, %v1168_v61 }
 0x34d   :  { %1607 = shalt.err (!%p1604_p0)
}
 0x34e   :  { %s1608_s6 = scalar_lea.hbm %s1771_s7, 16 }
 0x34f   :  { %p1609_p1 = scmp.ne.s32.totalorder %s1771_s7, %s1608_s6  ;;  %p1612_p2 = scmp.lt.u32.totalorder %s1608_s6, %s1771_s7 }
 0x351   :  { %p1614_p3 = pnand %p1612_p2, %p1609_p1 }
 0x353   :  { %1617 = shalt.err (!%p1614_p3)
}
 0x354   :  { %1182 = dma.vmem_to_hbm [thread:$0]  %s1180_s24, 16, %s1771_s7, [#allocation5]  }
 0x355   :  { %1622 = dma.done.wait [#allocation5], 16  }
 0x356   :  { %1623 = vsyncadd [#allocation5], 4294967280 }
 0x357   :  { %1186 = vsyncpa [#allocation4], 1 }
 0x358   :  { %1187 = vsyncpa [#allocation7], 1 }
 0x359   :  { %1188 = vsyncpa [#allocation5], 1 }

</bundles_post_ra>
